<compile_context>
chip_gen: v5e
topology: v5e:2x2
jax: 0.10.0
libtpu: 0.0.40
codegen_flags: <defaults>
</compile_context>

<pallas_src>
import functools

import jax
import jax.numpy as jnp
import numpy as np
from jax.experimental import pallas as pl
from jax.experimental.pallas import tpu as pltpu


def _yolo_decode_kernel(p_ref, g_ref, io_ref, *, stride, nc, arch, anchors_wh):
    """YOLO decode for one (batch, spatial-tile) block, channel-first layout.

    p_ref  : (1, na, C, TL)  raw predictions (original dtype), C = nc + 5
    g_ref  : (1, 1, 2, TL)   grid x (row 0) / grid y (row 1), pre-scaled by stride, f32
    io_ref : (1, na, C, TL)  decoded boxes / scores, f32
    anchors_wh : static tuple of na (w, h) pairs in pixels (== anchor_vec * stride)
    """
    f32 = jnp.float32
    na = p_ref.shape[1]
    tl = p_ref.shape[3]

    def _sigmoid(x):
        # 1 EUP push (tanh) + 2 VPU ops instead of exp + reciprocal (2 EUP pushes).
        return 0.5 * jnp.tanh(0.5 * x) + 0.5

    # One aligned full-slab load + in-kernel upcast.
    t = p_ref[...].astype(f32)

    # ---- channels 4: (objectness / classes): ONE aligned full-tile store ----
    sig_full = None
    if "default" in arch:
        sig_full = _sigmoid(t)
        io_ref[...] = sig_full                       # ch 0:4 overwritten below
    elif "BCE" in arch:
        sig_full = _sigmoid(t)
        io_ref[...] = sig_full                       # ch 0:5 overwritten below
    elif "CE" in arch:
        # Softmax over channels 4: (objectness included and then forced to 1,
        # exactly as in the reference module).  Masked full-slab form keeps all
        # loads/stores sublane-aligned; exp on channels 0:4 is wasted-but-cheap.
        cidx = jax.lax.broadcasted_iota(jnp.int32, t.shape, 2)
        valid = cidx >= 4
        m = jnp.max(jnp.where(valid, t, -jnp.inf), axis=2, keepdims=True)
        e = jnp.exp(t - m)
        denom = jnp.sum(jnp.where(valid, e, 0.0), axis=2, keepdims=True)
        io_ref[...] = e / denom                      # ch 0:5 overwritten below
    else:
        io_ref[...] = t                              # unknown arch: raw pass-through

    # ---- leading channels: xy / wh (+ objectness == 1 for BCE/CE) -----------
    # One masked store touching only the first 8-sublane tile of each anchor.
    if sig_full is not None:
        sxy = sig_full[:, :, 0:2, :]
    else:
        sxy = _sigmoid(t[:, :, 0:2, :])
    xy = sxy * stride + g_ref[...]                   # grid already scaled by stride

    # anchor_wh * stride == anchors (pixels): bake them as splat constants.
    awh = jnp.concatenate(
        [jnp.concatenate([jnp.full((1, 1, 1, tl), float(w), f32),
                          jnp.full((1, 1, 1, tl), float(h), f32)], axis=2)
         for (w, h) in anchors_wh],
        axis=1)                                      # (1, na, 2, tl)
    wh = jnp.exp(t[:, :, 2:4, :]) * awh

    if ("BCE" in arch) or ("CE" in arch):
        ones = jnp.ones((1, na, 1, tl), f32)
        io_ref[:, :, 0:5, :] = jnp.concatenate([xy, wh, ones], axis=2)
    else:
        io_ref[:, :, 0:4, :] = jnp.concatenate([xy, wh], axis=2)

    if nc == 1:
        # Single-class: class probability fixed to 1 (rare; one 1-sublane store).
        io_ref[:, :, 5:6, :] = jnp.ones((1, na, 1, tl), f32)


def _detect_num_tensorcores():
    """Chips whose TensorCores are sharded over the 'parallel' grid axes."""
    try:
        kind = jax.devices()[0].device_kind.lower()
    except Exception:
        return 1
    return 2 if any(v in kind for v in ("v4", "v5p", "v7")) else 1


def yolo_layer_forward(preds_nchw, anchors, nc, img_size, arch="default",
                       training=False, spatial_tile=2048, out_format="flat",
                       num_tensorcores=None):
    """Forward of YOLOLayer.

    Inference returns (io, preds_permuted); training returns only the permuted
    predictions (a pure XLA layout op, no kernel).  `out_format`:
      "flat"          : io shape (bs, na*ny*nx, nc+5) — matches the PyTorch module
                        (one XLA transpose of the kernel output).
      "channel_first" : io shape (bs, na, nc+5, ny*nx) — skips that extra HBM
                        round trip; io_cf[b, a, c, j*nx+i] == io_flat[b, a*ny*nx+j*nx+i, c].
    """
    bs, ch, ny, nx = preds_nchw.shape
    anchors_np = np.asarray(anchors, np.float32)     # model constants (concrete)
    na = anchors_np.shape[0]
    C = nc + 5
    assert ch == na * C, f"channel mismatch {ch} vs {na * C}"
    nxy = ny * nx
    stride = float(max(img_size)) / float(max(nx, ny))

    # preds.view(bs, na, C, ny, nx).permute(0, 1, 3, 4, 2) — module's second return
    # (and the training-mode return).  Pure XLA layout op; DCE'd under jit if unused.
    p_perm = preds_nchw.reshape(bs, na, C, ny, nx).transpose(0, 1, 3, 4, 2)
    if training:
        return p_perm

    # Channel-first, lane-dense view of the raw NCHW tensor: pure reshape, no copy.
    p_cf = preds_nchw.reshape(bs, na, C, nxy)

    # Compact grid side input (create_grids equivalent), pre-scaled by stride.
    yv, xv = jnp.meshgrid(jnp.arange(ny), jnp.arange(nx), indexing="ij")
    grid_xy = (jnp.stack([xv, yv], axis=0).astype(jnp.float32) * stride
               ).reshape(1, 1, 2, nxy)

    anchors_wh = tuple((float(w), float(h)) for w, h in anchors_np)

    # Spatial (lane) tiling: one block if the whole map fits, else 128-aligned
    # tiles so large feature maps stay within the default scoped VMEM (v5e:
    # 16 MiB -> tl=2048 is ~8.4 MB double-buffered, comfortable everywhere).
    if num_tensorcores is None:
        num_tensorcores = _detect_num_tensorcores()
    if nxy <= spatial_tile:
        tl = nxy
    else:
        assert spatial_tile % 128 == 0
        tl = spatial_tile
    n_sp = pl.cdiv(nxy, tl)
    # Megacore: make sure 2-TC chips get >= 2 parallel grid steps when bs == 1.
    if bs * n_sp < num_tensorcores and nxy > 128:
        tl = ((pl.cdiv(nxy, num_tensorcores) + 127) // 128) * 128
        n_sp = pl.cdiv(nxy, tl)

    kernel = functools.partial(_yolo_decode_kernel, stride=stride, nc=nc,
                               arch=arch, anchors_wh=anchors_wh)

    io_cf = pl.pallas_call(
        kernel,
        out_shape=jax.ShapeDtypeStruct((bs, na, C, nxy), jnp.float32),
        grid=(bs, n_sp),
        in_specs=[
            pl.BlockSpec((1, na, C, tl), lambda b, s: (b, 0, 0, s)),
            pl.BlockSpec((1, 1, 2, tl), lambda b, s: (0, 0, 0, s)),
        ],
        out_specs=pl.BlockSpec((1, na, C, tl), lambda b, s: (b, 0, 0, s)),
        compiler_params=pltpu.CompilerParams(
            dimension_semantics=("parallel", "parallel")),
    )(p_cf, grid_xy)

    if out_format == "channel_first":
        return io_cf, p_perm

    # Module-faithful channel-last flat output: one XLA transpose of the result.
    # TODO(synk): measure an in-kernel transposed out_spec ((1, na, tl, C)) vs
    # this extra HBM pass for large feature maps.
    io = jnp.transpose(io_cf, (0, 1, 3, 2)).reshape(bs, na * nxy, C)
    return io, p_perm


def _reference_default(preds_nchw, anchors, nc, img_size):
    """Pure-JAX reference of the 'default' arch inference path."""
    bs, ch, ny, nx = preds_nchw.shape
    na = anchors.shape[0]
    C = nc + 5
    stride = float(max(img_size)) / float(max(nx, ny))
    p = preds_nchw.reshape(bs, na, C, ny, nx).transpose(0, 1, 3, 4, 2).astype(jnp.float32)
    yv, xv = jnp.meshgrid(jnp.arange(ny), jnp.arange(nx), indexing="ij")
    grid_xy = jnp.stack((xv, yv), 2).astype(jnp.float32).reshape(1, 1, ny, nx, 2)
    anchor_wh = (anchors.astype(jnp.float32) / stride).reshape(1, na, 1, 1, 2)
    xy = (jax.nn.sigmoid(p[..., 0:2]) + grid_xy) * stride
    wh = jnp.exp(p[..., 2:4]) * anchor_wh * stride
    tail = jax.nn.sigmoid(p[..., 4:])
    io = jnp.concatenate([xy, wh, tail], axis=-1)
    return io.reshape(bs, -1, C), p


if __name__ == "__main__":
    # Small, YOLO-shaped example: bs=2, na=3 anchors, nc=80 classes, 13x13 grid.
    key = jax.random.PRNGKey(0)
    bs, na, nc, ny, nx = 2, 3, 80, 13, 13
    C = nc + 5
    img_size = (416, 416)
    anchors = jnp.array([[10.0, 13.0], [16.0, 30.0], [33.0, 23.0]], jnp.float32)

    preds = jax.random.normal(key, (bs, na * C, ny, nx), jnp.float32)

    io, p_perm = yolo_layer_forward(preds, anchors, nc, img_size, arch="default")
    io = jax.block_until_ready(io)
    p_perm = jax.block_until_ready(p_perm)

    io_ref, p_ref = _reference_default(preds, anchors, nc, img_size)
    np.testing.assert_allclose(np.asarray(io), np.asarray(io_ref), rtol=2e-5, atol=1e-4)
    np.testing.assert_allclose(np.asarray(p_perm), np.asarray(p_ref), rtol=1e-6, atol=1e-6)

    assert io.shape == (bs, na * ny * nx, C)
    assert p_perm.shape == (bs, na, ny, nx, C)
    print("KERNEL_OK")
</pallas_src>

<mosaic_0001>
module attributes {stable_mosaic.version = 11 : i64} {
  func.func @_yolo_decode_kernel(%arg0: i32, %arg1: i32, %arg2: memref<1x3x85x169xf32, #tpu.memory_space<vmem>>, %arg3: memref<1x1x2x169xf32, #tpu.memory_space<vmem>>, %arg4: memref<1x3x85x169xf32, #tpu.memory_space<vmem>>) attributes {dimension_semantics = [#tpu.dimension_semantics<parallel>, #tpu.dimension_semantics<parallel>], iteration_bounds = array<i64: 2, 1>, scalar_prefetch = 0 : i64, scratch_operands = 0 : i64, tpu.core_type = #tpu.core_type<tc>, window_params = [{transform_indices = @transform_0, window_bounds = array<i64: 1, 3, 85, 169>}, {transform_indices = @transform_1, window_bounds = array<i64: 1, 1, 2, 169>}, {transform_indices = @transform_2, window_bounds = array<i64: 1, 3, 85, 169>}]} {
    %c0 = arith.constant 0 : index
    %c0_0 = arith.constant 0 : index
    %c0_1 = arith.constant 0 : index
    %c0_2 = arith.constant 0 : index
    %0 = vector.load %arg2[%c0, %c0_0, %c0_1, %c0_2] : memref<1x3x85x169xf32, #tpu.memory_space<vmem>>, vector<1x3x85x169xf32>
    %cst = arith.constant 5.000000e-01 : f32
    %1 = vector.broadcast %cst : f32 to vector<1x3x85x169xf32>
    %2 = arith.mulf %1, %0 : vector<1x3x85x169xf32>
    %3 = math.tanh %2 : vector<1x3x85x169xf32>
    %cst_3 = arith.constant 5.000000e-01 : f32
    %4 = vector.broadcast %cst_3 : f32 to vector<1x3x85x169xf32>
    %5 = arith.mulf %4, %3 : vector<1x3x85x169xf32>
    %cst_4 = arith.constant 5.000000e-01 : f32
    %6 = vector.broadcast %cst_4 : f32 to vector<1x3x85x169xf32>
    %7 = arith.addf %5, %6 : vector<1x3x85x169xf32>
    %c0_5 = arith.constant 0 : index
    %c0_6 = arith.constant 0 : index
    %c0_7 = arith.constant 0 : index
    %c0_8 = arith.constant 0 : index
    %8 = vector.load %arg4[%c0_5, %c0_6, %c0_7, %c0_8] : memref<1x3x85x169xf32, #tpu.memory_space<vmem>>, vector<1x3x85x169xf32>
    tpu.vector_store %arg4[%c0_5, %c0_6, %c0_7, %c0_8], %7 {strides = array<i32>} : memref<1x3x85x169xf32, #tpu.memory_space<vmem>>, vector<1x3x85x169xf32>,
    %9 = vector.extract_strided_slice %7 {offsets = [0, 0, 0, 0], sizes = [1, 3, 2, 169], strides = [1, 1, 1, 1]} : vector<1x3x85x169xf32> to vector<1x3x2x169xf32>
    %cst_9 = arith.constant 3.200000e+01 : f32
    %10 = vector.broadcast %cst_9 : f32 to vector<1x3x2x169xf32>
    %11 = arith.mulf %9, %10 : vector<1x3x2x169xf32>
    %c0_10 = arith.constant 0 : index
    %c0_11 = arith.constant 0 : index
    %c0_12 = arith.constant 0 : index
    %c0_13 = arith.constant 0 : index
    %12 = vector.load %arg3[%c0_10, %c0_11, %c0_12, %c0_13] : memref<1x1x2x169xf32, #tpu.memory_space<vmem>>, vector<1x1x2x169xf32>
    %13 = vector.broadcast %12 : vector<1x1x2x169xf32> to vector<1x3x2x169xf32>
    %14 = arith.addf %11, %13 : vector<1x3x2x169xf32>
    %cst_14 = arith.constant 1.000000e+01 : f32
    %15 = vector.broadcast %cst_14 : f32 to vector<1x1x1x169xf32>
    %cst_15 = arith.constant 1.300000e+01 : f32
    %16 = vector.broadcast %cst_15 : f32 to vector<1x1x1x169xf32>
    %17 = tpu.concatenate %15, %16 in 2 : vector<1x1x1x169xf32>, vector<1x1x1x169xf32> -> vector<1x1x2x169xf32>
    %cst_16 = arith.constant 1.600000e+01 : f32
    %18 = vector.broadcast %cst_16 : f32 to vector<1x1x1x169xf32>
    %cst_17 = arith.constant 3.000000e+01 : f32
    %19 = vector.broadcast %cst_17 : f32 to vector<1x1x1x169xf32>
    %20 = tpu.concatenate %18, %19 in 2 : vector<1x1x1x169xf32>, vector<1x1x1x169xf32> -> vector<1x1x2x169xf32>
    %cst_18 = arith.constant 3.300000e+01 : f32
    %21 = vector.broadcast %cst_18 : f32 to vector<1x1x1x169xf32>
    %cst_19 = arith.constant 2.300000e+01 : f32
    %22 = vector.broadcast %cst_19 : f32 to vector<1x1x1x169xf32>
    %23 = tpu.concatenate %21, %22 in 2 : vector<1x1x1x169xf32>, vector<1x1x1x169xf32> -> vector<1x1x2x169xf32>
    %24 = tpu.concatenate %17, %20, %23 in 1 : vector<1x1x2x169xf32>, vector<1x1x2x169xf32>, vector<1x1x2x169xf32> -> vector<1x3x2x169xf32>
    %25 = vector.extract_strided_slice %0 {offsets = [0, 0, 2, 0], sizes = [1, 3, 2, 169], strides = [1, 1, 1, 1]} : vector<1x3x85x169xf32> to vector<1x3x2x169xf32>
    %26 = math.exp %25 : vector<1x3x2x169xf32>
    %27 = arith.mulf %26, %24 : vector<1x3x2x169xf32>
    %28 = tpu.concatenate %14, %27 in 2 : vector<1x3x2x169xf32>, vector<1x3x2x169xf32> -> vector<1x3x4x169xf32>
    %c0_20 = arith.constant 0 : index
    %c0_21 = arith.constant 0 : index
    %c0_22 = arith.constant 0 : index
    %c0_23 = arith.constant 0 : index
    %29 = vector.load %arg4[%c0_20, %c0_21, %c0_22, %c0_23] : memref<1x3x85x169xf32, #tpu.memory_space<vmem>>, vector<1x3x4x169xf32>
    tpu.vector_store %arg4[%c0_20, %c0_21, %c0_22, %c0_23], %28 {strides = array<i32>} : memref<1x3x85x169xf32, #tpu.memory_space<vmem>>, vector<1x3x4x169xf32>,
    return
  }
  func.func @transform_0(%arg0: i32, %arg1: i32) -> (i32, i32, i32, i32) {
    %c0_i32 = arith.constant 0 : i32
    %c0_i32_0 = arith.constant 0 : i32
    %c0_i32_1 = arith.constant 0 : i32
    return %arg0, %c0_i32, %c0_i32_0, %arg1 : i32, i32, i32, i32
  }
  func.func @transform_1(%arg0: i32, %arg1: i32) -> (i32, i32, i32, i32) {
    %c0_i32 = arith.constant 0 : i32
    %c0_i32_0 = arith.constant 0 : i32
    %c0_i32_1 = arith.constant 0 : i32
    %c0_i32_2 = arith.constant 0 : i32
    return %c0_i32, %c0_i32_0, %c0_i32_1, %arg1 : i32, i32, i32, i32
  }
  func.func @transform_2(%arg0: i32, %arg1: i32) -> (i32, i32, i32, i32) {
    %c0_i32 = arith.constant 0 : i32
    %c0_i32_0 = arith.constant 0 : i32
    %c0_i32_1 = arith.constant 0 : i32
    return %arg0, %c0_i32, %c0_i32_0, %arg1 : i32, i32, i32, i32
  }
}

</mosaic_0001>

<bundles_post_ra>
// kernel: tpu_custom_call.1
= control target key start
LH: loop header
LB: loop body
LE: loop exit
PB: predicated region body
PF: predicated region fallthrough
CT: control target
= control target key end

     0   :  { %s1004_s9 = smov 0   ;;  %s1006_s10 = smov 0   ;;  %s1462_s0 = inlined_call_operand.vmem [shape: f32[2,3,85,169], index: 0, kind: input, shape index: {}]   ;;  %s1463_s1 = inlined_call_operand.vmem [shape: f32[1,1,2,169], index: 1, kind: input, shape index: {}]   ;;  %s1464_s2 = inlined_call_operand.vmem [shape: f32[2,3,85,169], index: 2, kind: output, shape index: {}]  }
   0x1   :  { %s1008_s11 = smov 0  }
   0x2 LB: > { %s24_s12 = sadd.s32 1, %s980_s10  ;;  %p785_p0 = scmp.ge.s32.totalorder %s984_s11, 1  ;;  %s984_s11 = sphi %s1008_s11, %s12_s11   ;;  %s980_s10 = sphi %s1006_s10, %s1466_s10   ;;  %s976_s9 = sphi %s1004_s9, %s1465_s9  }
   0x3   : > { %p26_p1 = scmp.ge.s32.totalorder %s24_s12, 2  ;;  %p144_p2 = scmp.lt.s32.totalorder %s984_s11, 3 }
   0x5   : > { %s1468_s12 = smov (%p26_p1, %s24_s12), 0  ;;  %p145_p3 = pnand %p785_p0, %p144_p2 }
   0x6   : > { %p180_p4 = scmp.lt.s32.totalorder (!%p145_p3), %s976_s9, 1 }
   0x7   : > { %148 = sbr.rel (%p145_p3) target bundleno = 111 (0x6f), region = 28 }
   0xc   : > { %v609_v0 = vld [vmem:[%s1463_s1] sm:$0xf]  ;;  %s1470_s9 = smov (!%p180_p4, %s976_s9), 1  ;;  %vm536_vm0 = vcmask 334848   ;;  %vm557_vm1 = vcmask 331776   ;;  %vm633_vm2 = vcmask 1040384  }
   0xd   : > { %611 = vst [vmem:[#allocation1] ss:$4 sm:$0xff] %v609_v0  ;;  %s790_s15 = smul.u32 528, %s1470_s9  ;;  %vm664_vm3 = vcmask 1041408   ;;  %vm672_vm4 = vcmask 330752  }
   0xe   : > { %615 = vst [vmem:[#allocation1 + $0x20] ss:$4 sm:$0xff] %v609_v0 }
   0xf   : > { %s1033_s18 = scalar_lea.vmem %s1462_s0, %s790_s15  ;;  %s1081_s21 = scalar_lea.vmem %s1464_s2, %s790_s15 }
  0x10   : > { %v205_v1 = vld [vmem:[%s1033_s18] sm:$0xff]  ;;  %v206_v2 = vld [vmem:[%s1033_s18 + $0x8] sm:$0xff]  ;;  %v227_v3 = vld [vmem:[%s1033_s18 + $0xb0] sm:$0xff] }
  0x11   : > { %v271_v6 = vmul.f32 0.5, %v205_v1  ;;  %v637_v7 = vmul.f32 1.442695, %v205_v1  ;;  %v272_v8 = vmul.f32 0.5, %v206_v2  ;;  %v639_v9 = vmul.f32 1.442695, %v206_v2 }
  0x12   : > { %v293_v10 = vmul.f32 0.5, %v227_v3  ;;  %v228_v11 = vld [vmem:[%s1033_s18 + $0xb8] sm:$0xff]  ;;  %v641_v12 = vmul.f32 1.442695, %v227_v3  ;;  %v249_v13 = vld [vmem:[%s1033_s18 + $0x160] sm:$0xff]  ;;  %v250_v14 = vld [vmem:[%s1033_s18 + $0x168] sm:$0xff] }
  0x13   : > { %818 = vtanh.f32 %v271_v6  ;;  %v294_v15 = vmul.f32 0.5, %v228_v11  ;;  %v643_v16 = vmul.f32 1.442695, %v228_v11  ;;  %v207_v17 = vld [vmem:[%s1033_s18 + $0x10] sm:$0xff]  ;;  %v208_v18 = vld [vmem:[%s1033_s18 + $0x18] sm:$0xff]  ;;  %v209_v19 = vld [vmem:[%s1033_s18 + $0x20] sm:$0xff] }
  0x14   : > { %v1038_v4 = vld.sshfl [vmem:[#allocation1] sm:$0xff pattern:$0x73625140]  ;;  %v1040_v5 = vld.sshfl [vmem:[#allocation1 + $0x8] sm:$0xff pattern:$0x73625140]  ;;  %820 = vpow2.f32 %v637_v7 }
  0x15   : > { %618 = vst [vmem:[#allocation1] ss:$4 sm:$0xff] %v609_v0  ;;  %822 = vtanh.f32 %v272_v8  ;;  %v645_v20 = vmul.f32 1.442695, %v249_v13  ;;  %v210_v21 = vld [vmem:[%s1033_s18 + $0x28] sm:$0xff]  ;;  %v211_v22 = vld [vmem:[%s1033_s18 + $0x30] sm:$0xff] }
  0x16   : > { %824 = vpow2.f32 %v639_v9  ;;  %v212_v23 = vld [vmem:[%s1033_s18 + $0x38] sm:$0xff]  ;;  %v315_v24 = vmul.f32 0.5, %v249_v13  ;;  %v316_v25 = vmul.f32 0.5, %v250_v14  ;;  %v647_v26 = vmul.f32 1.442695, %v250_v14  ;;  %v213_v27 = vld [vmem:[%s1033_s18 + $0x40] sm:$0xff] }
  0x17   : > { %826 = vtanh.f32 %v293_v10  ;;  %v214_v28 = vld [vmem:[%s1033_s18 + $0x48] sm:$0xff]  ;;  %v273_v29 = vmul.f32 0.5, %v207_v17  ;;  %v1053_v30 = vmul.f32 0.5, %v208_v18  ;;  %v1055_v31 = vmul.f32 0.5, %v209_v19  ;;  %v215_v32 = vld [vmem:[%s1033_s18 + $0x50] sm:$0xff]  ;;  %v216_v37 = vld [vmem:[%s1033_s18 + $0x58] sm:$0xff] }
  0x18   : > { %828 = vpow2.f32 %v641_v12  ;;  %v1058_v34 = vmul.f32 0.5, %v210_v21  ;;  %v1060_v35 = vmul.f32 0.5, %v211_v22  ;;  %v1062_v36 = vmul.f32 0.5, %v212_v23  ;;  %v217_v38 = vld [vmem:[%s1033_s18 + $0x60] sm:$0xff]  ;;  %v218_v39 = vld [vmem:[%s1033_s18 + $0x68] sm:$0xff]  ;;  %v219_v44 = vld [vmem:[%s1033_s18 + $0x70] sm:$0xff] }
  0x19   : > { %v819_v33 = vpop.eup %818  ;;  %830 = vtanh.f32 %v294_v15  ;;  %v1069_v42 = vmul.f32 0.5, %v213_v27  ;;  %v1071_v43 = vmul.f32 0.5, %v214_v28  ;;  %v220_v45 = vld [vmem:[%s1033_s18 + $0x78] sm:$0xff]  ;;  %v221_v46 = vld [vmem:[%s1033_s18 + $0x80] sm:$0xff]  ;;  %v1083_v48 = vmul.f32 0.5, %v215_v32  ;;  %v222_v55 = vld [vmem:[%s1033_s18 + $0x88] sm:$0xff] }
  0x1a   : > { %v1067_v40 = vpop.eup %820  ;;  %v403_v41 = vmul.f32 0.5, %v819_v33  ;;  %832 = vpow2.f32 %v643_v16  ;;  %v1085_v49 = vmul.f32 0.5, %v216_v37  ;;  %v1087_v50 = vmul.f32 0.5, %v217_v38  ;;  %v223_v56 = vld [vmem:[%s1033_s18 + $0x90] sm:$0xff]  ;;  %v224_v57 = vld [vmem:[%s1033_s18 + $0x98] sm:$0xff]  ;;  %v229_v6 = vld [vmem:[%s1033_s18 + $0xc0] sm:$0xff] }
  0x1b   : > { %v823_v47 = vpop.eup %822  ;;  %834 = vtanh.f32 %v315_v24  ;;  %v1091_v54 = vmul.f32 0.5, %v218_v39  ;;  %v1096_v59 = vmul.f32 0.5, %v219_v44  ;;  %v1098_v60 = vmul.f32 0.5, %v220_v45  ;;  %v225_v62 = vld [vmem:[%s1033_s18 + $0xa0] sm:$0x1f]  ;;  %v230_v11 = vld [vmem:[%s1033_s18 + $0xc8] sm:$0xff] }
  0x1c   : > { %v1089_v51 = vpop.eup %824  ;;  %v469_v52 = vadd.f32 0.5, %v403_v41  ;;  %v404_v53 = vmul.f32 0.5, %v823_v47  ;;  %836 = vpow2.f32 %v645_v20  ;;  %v1100_v61 = vmul.f32 0.5, %v221_v46  ;;  %v226_v3 = vld [vmem:[%s1033_s18 + $0xa8] sm:$0x1f]  ;;  %v231_v18 = vld [vmem:[%s1033_s18 + $0xd0] sm:$0xff] }
  0x1d   : > { %v827_v58 = vpop.eup %826  ;;  %838 = vtanh.f32 %v316_v25  ;;  %v1108_v8 = vmul.f32 0.5, %v222_v55  ;;  %v1110_v9 = vmul.f32 0.5, %v223_v56  ;;  %v1112_v10 = vmul.f32 0.5, %v224_v57  ;;  %v616_v15 = vld.sshfl [vmem:[#allocation1 + $0x20] sm:$0xff pattern:$0x73625140] }
  0x1e   : > { %v1103_v63 = vpop.eup %828  ;;  %535 = vst [vmem:[%s1081_s21] sm:$0xff] %v469_v52  ;;  %v603_v0 = vmul.f32 32.0, %v469_v52  ;;  %v470_v1 = vadd.f32 0.5, %v404_v53  ;;  %v425_v2 = vmul.f32 0.5, %v827_v58  ;;  %840 = vpow2.f32 %v647_v26  ;;  %v232_v19 = vld [vmem:[%s1033_s18 + $0xd8] sm:$0xff]  ;;  %v233_v23 = vld [vmem:[%s1033_s18 + $0xe0] sm:$0xff]  ;;  %v234_v24 = vld [vmem:[%s1033_s18 + $0xe8] sm:$0xff] }
  0x1f   : > { %v831_v7 = vpop.eup %830  ;;  %842 = vtanh.f32 %v273_v29  ;;  %v1122_v17 = vmul.f32 0.5, %v225_v62  ;;  %v1129_v22 = vmul.f32 0.5, %v226_v3  ;;  %v235_v29 = vld [vmem:[%s1033_s18 + $0xf0] sm:$0xff]  ;;  %v1141_v32 = vmul.f32 0.5, %v230_v11  ;;  %v236_v38 = vld [vmem:[%s1033_s18 + $0xf8] sm:$0xff]  ;;  %v237_v39 = vld [vmem:[%s1033_s18 + $0x100] sm:$0xff] }
  0x20   : > { %v1115_v12 = vpop.eup %832  ;;  %v1118_v13 = vadd.f32 %v1038_v4, %v603_v0  ;;  %537 = vst.msk [vmem:[%s1081_s21 + $0x8] sm:$0xff] %vm536_vm0, %v470_v1  ;;  %v491_v14 = vadd.f32 0.5, %v425_v2  ;;  %v426_v16 = vmul.f32 0.5, %v831_v7  ;;  %v1126_v21 = vmul.f32 32.0, %v470_v1  ;;  %v238_v47 = vld [vmem:[%s1033_s18 + $0x108] sm:$0xff]  ;;  %v239_v57 = vld [vmem:[%s1033_s18 + $0x110] sm:$0xff] }
  0x21   : > { %v835_v20 = vpop.eup %834  ;;  %844 = vtanh.f32 %v1053_v30  ;;  %v1131_v4 = vmul.f32 0.5, %v229_v6  ;;  %v1143_v33 = vmul.f32 0.5, %v231_v18  ;;  %v1145_v37 = vmul.f32 0.5, %v232_v19  ;;  %v619_v44 = vld.sshfl [vmem:[#allocation1] sm:$0xff pattern:$0x73625140] }
  0x22   : > { %v1135_v25 = vpop.eup %836  ;;  %559 = vst [vmem:[%s1081_s21 + $0xb0] sm:$0xff] %v491_v14  ;;  %v605_v26 = vmul.f32 32.0, %v491_v14  ;;  %v492_v27 = vadd.f32 0.5, %v426_v16  ;;  %v447_v28 = vmul.f32 0.5, %v835_v20  ;;  %846 = vtanh.f32 %v1055_v31  ;;  %v240_v58 = vld [vmem:[%s1033_s18 + $0x118] sm:$0xff]  ;;  %v241_v7 = vld [vmem:[%s1033_s18 + $0x120] sm:$0xff] }
  0x23   : > { %v839_v30 = vpop.eup %838  ;;  %848 = vtanh.f32 %v1058_v34  ;;  %v1153_v46 = vmul.f32 0.5, %v233_v23  ;;  %v1155_v34 = vmul.f32 0.5, %v234_v24  ;;  %v1163_v56 = vmul.f32 0.5, %v235_v29  ;;  %v242_v11 = vld [vmem:[%s1033_s18 + $0x128] sm:$0xff]  ;;  %v243_v18 = vld [vmem:[%s1033_s18 + $0x130] sm:$0xff] }
  0x24   : > { %v1149_v41 = vpop.eup %840  ;;  %560 = vst.msk [vmem:[%s1081_s21 + $0xb8] sm:$0xff] %vm536_vm0, %v492_v27  ;;  %v513_v31 = vadd.f32 0.5, %v447_v28  ;;  %v448_v45 = vmul.f32 0.5, %v839_v30  ;;  %v1158_v53 = vadd.f32 %v616_v15, %v605_v26  ;;  %v1160_v55 = vmul.f32 32.0, %v492_v27  ;;  %v244_v26 = vld [vmem:[%s1033_s18 + $0x138] sm:$0xff]  ;;  %v245_v27 = vld [vmem:[%s1033_s18 + $0x140] sm:$0xff] }
  0x25   : > { %v843_v52 = vpop.eup %842  ;;  %850 = vtanh.f32 %v1060_v35  ;;  %v1170_v3 = vmul.f32 0.5, %v236_v38  ;;  %v1172_v6 = vmul.f32 0.5, %v237_v39  ;;  %v1174_v35 = vmul.f32 0.5, %v238_v47  ;;  %v246_v28 = vld [vmem:[%s1033_s18 + $0x148] sm:$0xff]  ;;  %v247_v39 = vld [vmem:[%s1033_s18 + $0x150] sm:$0x1f] }
  0x26   : > { %581 = vst [vmem:[%s1081_s21 + $0x160] sm:$0xff] %v513_v31  ;;  %v607_v62 = vmul.f32 32.0, %v513_v31  ;;  %v514_v0 = vadd.f32 0.5, %v448_v45  ;;  %v405_v1 = vmul.f32 0.5, %v843_v52  ;;  %852 = vtanh.f32 %v1062_v36  ;;  %v248_v47 = vld [vmem:[%s1033_s18 + $0x158] sm:$0x1f] }
  0x27   : > { %v845_v2 = vpop.eup %844  ;;  %854 = vtanh.f32 %v1069_v42  ;;  %v1180_v16 = vmul.f32 0.5, %v239_v57  ;;  %v1182_v42 = vmul.f32 0.5, %v240_v58  ;;  %v1195_v38 = vmul.f32 0.5, %v241_v7  ;;  %v252_v7 = vld [vmem:[%s1033_s18 + $0x178] sm:$0xff] }
  0x28   : > { %v847_v14 = vpop.eup %846  ;;  %582 = vst.msk [vmem:[%s1081_s21 + $0x168] sm:$0xff] %vm536_vm0, %v514_v0  ;;  %v471_v15 = vadd.f32 0.5, %v405_v1  ;;  %v406_v36 = vmul.f32 0.5, %v845_v2  ;;  %v1185_v20 = vadd.f32 %v619_v44, %v607_v62  ;;  %v1187_v23 = vmul.f32 32.0, %v514_v0  ;;  %v251_v62 = vld [vmem:[%s1033_s18 + $0x170] sm:$0xff] }
  0x29   : > { %v849_v19 = vpop.eup %848  ;;  %v407_v24 = vmul.f32 0.5, %v847_v14  ;;  %856 = vtanh.f32 %v1071_v43  ;;  %v1199_v45 = vmul.f32 0.5, %v242_v11  ;;  %v1201_v43 = vmul.f32 0.5, %v243_v18 }
  0x2a   : > { %538 = vst [vmem:[%s1081_s21 + $0x10] sm:$0xff] %v471_v15  ;;  %v472_v29 = vadd.f32 0.5, %v406_v36  ;;  %v408_v30 = vmul.f32 0.5, %v849_v19  ;;  %858 = vtanh.f32 %v1083_v48  ;;  %v1207_v58 = vmul.f32 0.5, %v244_v26  ;;  %v253_v15 = vld [vmem:[%s1033_s18 + $0x180] sm:$0xff]  ;;  %v254_v36 = vld [vmem:[%s1033_s18 + $0x188] sm:$0xff] }
  0x2b   : > { %v851_v31 = vpop.eup %850  ;;  %v473_v44 = vadd.f32 0.5, %v407_v24  ;;  %860 = vtanh.f32 %v1085_v49  ;;  %v1212_v1 = vmul.f32 0.5, %v245_v27  ;;  %v1214_v2 = vmul.f32 0.5, %v246_v28  ;;  %v255_v26 = vld [vmem:[%s1033_s18 + $0x190] sm:$0xff] }
  0x2c   : > { %v853_v52 = vpop.eup %852  ;;  %539 = vst.msk [vmem:[%s1081_s21 + $0x18] sm:$0xff] %vm536_vm0, %v472_v29  ;;  %v474_v57 = vadd.f32 0.5, %v408_v30  ;;  %v409_v48 = vmul.f32 0.5, %v851_v31  ;;  %862 = vtanh.f32 %v1087_v50  ;;  %v1220_v14 = vmul.f32 0.5, %v247_v39  ;;  %v256_v30 = vld [vmem:[%s1033_s18 + $0x198] sm:$0xff] }
  0x2d   : > { %v855_v49 = vpop.eup %854  ;;  %540 = vst [vmem:[%s1081_s21 + $0x20] sm:$0xff] %v473_v44  ;;  %v410_v0 = vmul.f32 0.5, %v853_v52  ;;  %864 = vtanh.f32 %v1091_v54  ;;  %v1225_v19 = vmul.f32 0.5, %v248_v47  ;;  %v1227_v24 = vmul.f32 0.5, %v251_v62  ;;  %v257_v47 = vld [vmem:[%s1033_s18 + $0x1a0] sm:$0xff]  ;;  %v258_v62 = vld [vmem:[%s1033_s18 + $0x1a8] sm:$0xff] }
  0x2e   : > { %541 = vst.msk [vmem:[%s1081_s21 + $0x28] sm:$0xff] %vm536_vm0, %v474_v57  ;;  %v475_v11 = vadd.f32 0.5, %v409_v48  ;;  %v411_v50 = vmul.f32 0.5, %v855_v49  ;;  %866 = vtanh.f32 %v1096_v59  ;;  %v1232_v29 = vmul.f32 0.5, %v252_v7 }
  0x2f   : > { %v857_v54 = vpop.eup %856  ;;  %v476_v18 = vadd.f32 0.5, %v410_v0  ;;  %868 = vtanh.f32 %v1098_v60  ;;  %v1238_v31 = vmul.f32 0.5, %v253_v15  ;;  %v1240_v44 = vmul.f32 0.5, %v254_v36 }
  0x30   : > { %v859_v27 = vpop.eup %858  ;;  %542 = vst [vmem:[%s1081_s21 + $0x30] sm:$0xff] %v475_v11  ;;  %v477_v59 = vadd.f32 0.5, %v411_v50  ;;  %v412_v28 = vmul.f32 0.5, %v857_v54  ;;  %870 = vtanh.f32 %v1100_v61  ;;  %v1245_v48 = vmul.f32 0.5, %v255_v26  ;;  %v259_v11 = vld [vmem:[%s1033_s18 + $0x1b0] sm:$0xff]  ;;  %v260_v54 = vld [vmem:[%s1033_s18 + $0x1b8] sm:$0xff] }
  0x31   : > { %v861_v39 = vpop.eup %860  ;;  %543 = vst.msk [vmem:[%s1081_s21 + $0x38] sm:$0xff] %vm536_vm0, %v476_v18  ;;  %v413_v60 = vmul.f32 0.5, %v859_v27  ;;  %872 = vtanh.f32 %v1108_v8  ;;  %v1249_v7 = vmul.f32 0.5, %v256_v30  ;;  %v1260_v27 = vmul.f32 0.5, %v258_v62 }
  0x32   : > { %v863_v52 = vpop.eup %862  ;;  %544 = vst [vmem:[%s1081_s21 + $0x40] sm:$0xff] %v477_v59  ;;  %v478_v61 = vadd.f32 0.5, %v412_v28  ;;  %v414_v57 = vmul.f32 0.5, %v861_v39  ;;  %874 = vtanh.f32 %v1110_v9  ;;  %v1255_v9 = vmul.f32 0.5, %v257_v47  ;;  %v261_v59 = vld [vmem:[%s1033_s18 + $0x1c0] sm:$0xff] }
  0x33   : > { %v865_v49 = vpop.eup %864  ;;  %v479_v8 = vadd.f32 0.5, %v413_v60  ;;  %v415_v0 = vmul.f32 0.5, %v863_v52  ;;  %876 = vtanh.f32 %v1112_v10  ;;  %v1266_v39 = vmul.f32 0.5, %v259_v11  ;;  %v262_v60 = vld [vmem:[%s1033_s18 + $0x1c8] sm:$0xff] }
  0x34   : > { %v867_v50 = vpop.eup %866  ;;  %545 = vst.msk [vmem:[%s1081_s21 + $0x48] sm:$0xff] %vm536_vm0, %v478_v61  ;;  %v480_v15 = vadd.f32 0.5, %v414_v57  ;;  %v416_v36 = vmul.f32 0.5, %v865_v49  ;;  %878 = vtanh.f32 %v1122_v17  ;;  %v1271_v61 = vmul.f32 0.5, %v260_v54  ;;  %v263_v57 = vld [vmem:[%s1033_s18 + $0x1d0] sm:$0xff] }
  0x35   : > { %v869_v18 = vpop.eup %868  ;;  %546 = vst [vmem:[%s1081_s21 + $0x50] sm:$0xff] %v479_v8  ;;  %v481_v10 = vadd.f32 0.5, %v415_v0  ;;  %v417_v26 = vmul.f32 0.5, %v867_v50  ;;  %880 = vtanh.f32 %v1129_v22  ;;  %v1277_v8 = vmul.f32 0.5, %v261_v59  ;;  %v264_v0 = vld [vmem:[%s1033_s18 + $0x1d8] sm:$0xff] }
  0x36   : > { %v871_v28 = vpop.eup %870  ;;  %547 = vst.msk [vmem:[%s1081_s21 + $0x58] sm:$0xff] %vm536_vm0, %v480_v15  ;;  %v482_v17 = vadd.f32 0.5, %v416_v36  ;;  %v418_v30 = vmul.f32 0.5, %v869_v18  ;;  %882 = vtanh.f32 %v1131_v4  ;;  %v1282_v15 = vmul.f32 0.5, %v262_v60  ;;  %v265_v36 = vld [vmem:[%s1033_s18 + $0x1e0] sm:$0xff] }
  0x37   : > { %v873_v47 = vpop.eup %872  ;;  %548 = vst [vmem:[%s1081_s21 + $0x60] sm:$0xff] %v481_v10  ;;  %v483_v22 = vadd.f32 0.5, %v417_v26  ;;  %v419_v52 = vmul.f32 0.5, %v871_v28  ;;  %884 = vtanh.f32 %v1141_v32  ;;  %v1288_v10 = vmul.f32 0.5, %v263_v57  ;;  %v266_v26 = vld [vmem:[%s1033_s18 + $0x1e8] sm:$0xff] }
  0x38   : > { %v875_v62 = vpop.eup %874  ;;  %549 = vst.msk [vmem:[%s1081_s21 + $0x68] sm:$0xff] %vm536_vm0, %v482_v17  ;;  %v484_v4 = vadd.f32 0.5, %v418_v30  ;;  %v420_v49 = vmul.f32 0.5, %v873_v47  ;;  %886 = vtanh.f32 %v1143_v33  ;;  %v1293_v17 = vmul.f32 0.5, %v264_v0  ;;  %v267_v30 = vld [vmem:[%s1033_s18 + $0x1f0] sm:$0xff] }
  0x39   : > { %v877_v11 = vpop.eup %876  ;;  %550 = vst [vmem:[%s1081_s21 + $0x70] sm:$0xff] %v483_v22  ;;  %v485_v32 = vadd.f32 0.5, %v419_v52  ;;  %v421_v50 = vmul.f32 0.5, %v875_v62  ;;  %888 = vtanh.f32 %v1145_v37  ;;  %v1299_v22 = vmul.f32 0.5, %v265_v36  ;;  %v268_v52 = vld [vmem:[%s1033_s18 + $0x1f8] sm:$0xff] }
  0x3a   : > { %v879_v54 = vpop.eup %878  ;;  %551 = vst.msk [vmem:[%s1081_s21 + $0x78] sm:$0xff] %vm536_vm0, %v484_v4  ;;  %v486_v33 = vadd.f32 0.5, %v420_v49  ;;  %v422_v18 = vmul.f32 0.5, %v877_v11  ;;  %890 = vtanh.f32 %v1153_v46  ;;  %v1304_v4 = vmul.f32 0.5, %v266_v26  ;;  %v269_v49 = vld [vmem:[%s1033_s18 + $0x200] sm:$0x1f] }
  0x3b   : > { %v881_v59 = vpop.eup %880  ;;  %552 = vst [vmem:[%s1081_s21 + $0x80] sm:$0xff] %v485_v32  ;;  %v487_v37 = vadd.f32 0.5, %v421_v50  ;;  %v423_v28 = vmul.f32 0.5, %v879_v54  ;;  %892 = vtanh.f32 %v1155_v34 }
  0x3c   : > { %v883_v60 = vpop.eup %882  ;;  %553 = vst.msk [vmem:[%s1081_s21 + $0x88] sm:$0xff] %vm536_vm0, %v486_v33  ;;  %v488_v46 = vadd.f32 0.5, %v422_v18  ;;  %v424_v47 = vmul.f32 0.5, %v881_v59  ;;  %894 = vtanh.f32 %v1163_v56  ;;  %v1310_v56 = vmul.f32 0.5, %v267_v30 }
  0x3d   : > { %v885_v57 = vpop.eup %884  ;;  %554 = vst [vmem:[%s1081_s21 + $0x90] sm:$0xff] %v487_v37  ;;  %v489_v62 = vadd.f32 0.5, %v423_v28  ;;  %v427_v34 = vmul.f32 0.5, %v883_v60  ;;  %896 = vtanh.f32 %v1170_v3  ;;  %v1314_v3 = vmul.f32 0.5, %v268_v52 }
  0x3e   : > { %v887_v0 = vpop.eup %886  ;;  %555 = vst.msk [vmem:[%s1081_s21 + $0x98] sm:$0xff] %vm536_vm0, %v488_v46  ;;  %v490_v11 = vadd.f32 0.5, %v424_v47  ;;  %v428_v32 = vmul.f32 0.5, %v885_v57  ;;  %898 = vtanh.f32 %v1172_v6  ;;  %v1319_v6 = vmul.f32 0.5, %v269_v49 }
  0x3f   : > { %v889_v50 = vpop.eup %888  ;;  %556 = vst [vmem:[%s1081_s21 + $0xa0] sm:$0x1f] %v489_v62  ;;  %v493_v36 = vadd.f32 0.5, %v427_v34  ;;  %v429_v54 = vmul.f32 0.5, %v887_v0  ;;  %900 = vtanh.f32 %v1174_v35  ;;  %v986_v52 = vmov 13.0  }
  0x40   : > { %v891_v33 = vpop.eup %890  ;;  %558 = vst.msk [vmem:[%s1081_s21 + $0xa8] sm:$0x1f] %vm557_vm1, %v490_v11  ;;  %v494_v18 = vadd.f32 0.5, %v428_v32  ;;  %v430_v26 = vmul.f32 0.5, %v889_v50  ;;  %902 = vtanh.f32 %v1180_v16  ;;  %v634_v57 = vsel %vm633_vm2, 10.0, %v986_v52 }
  0x41   : > { %v893_v59 = vpop.eup %892  ;;  %561 = vst [vmem:[%s1081_s21 + $0xc0] sm:$0xff] %v493_v36  ;;  %v495_v37 = vadd.f32 0.5, %v429_v54  ;;  %v431_v28 = vmul.f32 0.5, %v891_v33  ;;  %904 = vtanh.f32 %v1182_v42  ;;  %v652_v49 = vrot.slane %v634_v57, 6 }
  0x42   : > { %v895_v35 = vpop.eup %894  ;;  %562 = vst.msk [vmem:[%s1081_s21 + $0xc8] sm:$0xff] %vm536_vm0, %v494_v18  ;;  %v496_v30 = vadd.f32 0.5, %v430_v26  ;;  %v432_v60 = vmul.f32 0.5, %v893_v59  ;;  %906 = vtanh.f32 %v1195_v38 }
  0x43   : > { %v897_v46 = vpop.eup %896  ;;  %563 = vst [vmem:[%s1081_s21 + $0xd0] sm:$0xff] %v495_v37  ;;  %v497_v16 = vadd.f32 0.5, %v431_v28  ;;  %v433_v47 = vmul.f32 0.5, %v895_v35  ;;  %908 = vtanh.f32 %v1199_v45  ;;  %v658_v36 = vmul.f32 %v1067_v40, %v652_v49 }
  0x44   : > { %v899_v42 = vpop.eup %898  ;;  %564 = vst.msk [vmem:[%s1081_s21 + $0xd8] sm:$0xff] %vm536_vm0, %v496_v30  ;;  %v498_v62 = vadd.f32 0.5, %v432_v60  ;;  %v434_v34 = vmul.f32 0.5, %v897_v46  ;;  %910 = vtanh.f32 %v1201_v43 }
  0x45   : > { %v901_v38 = vpop.eup %900  ;;  %565 = vst [vmem:[%s1081_s21 + $0xe0] sm:$0xff] %v497_v16  ;;  %v499_v0 = vadd.f32 0.5, %v433_v47  ;;  %v435_v11 = vmul.f32 0.5, %v899_v42  ;;  %912 = vtanh.f32 %v1207_v58  ;;  %v1346_v40 = vsel %vm664_vm3, %v1118_v13, %v658_v36 }
  0x46   : > { %v903_v45 = vpop.eup %902  ;;  %566 = vst.msk [vmem:[%s1081_s21 + $0xe8] sm:$0xff] %vm536_vm0, %v498_v62  ;;  %v500_v32 = vadd.f32 0.5, %v434_v34  ;;  %v436_v50 = vmul.f32 0.5, %v901_v38  ;;  %914 = vtanh.f32 %v1212_v1  ;;  %v270_v1 = vld [vmem:[%s1033_s18 + $0x208] sm:$0x1f]  ;;  %v659_v13 = vmul.f32 %v1089_v51, %v652_v49 }
  0x47   : > { %v905_v43 = vpop.eup %904  ;;  %567 = vst [vmem:[%s1081_s21 + $0xf0] sm:$0xff] %v499_v0  ;;  %v501_v54 = vadd.f32 0.5, %v435_v11  ;;  %v437_v33 = vmul.f32 0.5, %v903_v45  ;;  %916 = vtanh.f32 %v1214_v2  ;;  %v628_v2 = vadd.f32 %v1040_v5, %v1126_v21  ;;  %v617_v51 = vld.sshfl [vmem:[#allocation1 + $0x28] sm:$0xff pattern:$0x73625140] }
  0x48   : > { %v907_v58 = vpop.eup %906  ;;  %568 = vst.msk [vmem:[%s1081_s21 + $0xf8] sm:$0xff] %vm536_vm0, %v500_v32  ;;  %v502_v18 = vadd.f32 0.5, %v436_v50  ;;  %v438_v26 = vmul.f32 0.5, %v905_v43  ;;  %918 = vtanh.f32 %v1220_v14 }
  0x49   : > { %v909_v59 = vpop.eup %908  ;;  %569 = vst [vmem:[%s1081_s21 + $0x100] sm:$0xff] %v501_v54  ;;  %v503_v37 = vadd.f32 0.5, %v437_v33  ;;  %v439_v28 = vmul.f32 0.5, %v907_v58  ;;  %920 = vtanh.f32 %v1225_v19  ;;  %v1358_v19 = vmul.f32 0.5, %v270_v1 }
  0x4a   : > { %v911_v35 = vpop.eup %910  ;;  %570 = vst.msk [vmem:[%s1081_s21 + $0x108] sm:$0xff] %vm536_vm0, %v502_v18  ;;  %v504_v14 = vadd.f32 0.5, %v438_v26  ;;  %v440_v30 = vmul.f32 0.5, %v909_v59  ;;  %922 = vtanh.f32 %v1227_v24  ;;  %v1364_v24 = vsel %vm664_vm3, %v628_v2, %v659_v13 }
  0x4b   : > { %v913_v60 = vpop.eup %912  ;;  %571 = vst [vmem:[%s1081_s21 + $0x110] sm:$0xff] %v503_v37  ;;  %v505_v46 = vadd.f32 0.5, %v439_v28  ;;  %v441_v16 = vmul.f32 0.5, %v911_v35  ;;  %924 = vtanh.f32 %v1232_v29  ;;  %v987_v29 = vmov 30.0  }
  0x4c   : > { %v915_v5 = vpop.eup %914  ;;  %572 = vst.msk [vmem:[%s1081_s21 + $0x118] sm:$0xff] %vm536_vm0, %v504_v14  ;;  %v506_v21 = vadd.f32 0.5, %v440_v30  ;;  %v442_v47 = vmul.f32 0.5, %v913_v60  ;;  %926 = vtanh.f32 %v1238_v31  ;;  %v635_v62 = vsel %vm633_vm2, 16.0, %v987_v29 }
  0x4d   : > { %v917_v52 = vpop.eup %916  ;;  %573 = vst [vmem:[%s1081_s21 + $0x120] sm:$0xff] %v505_v46  ;;  %v507_v57 = vadd.f32 0.5, %v441_v16  ;;  %v443_v42 = vmul.f32 0.5, %v915_v5  ;;  %928 = vtanh.f32 %v1240_v44  ;;  %v653_v38 = vrot.slane %v635_v62, 6 }
  0x4e   : > { %v919_v34 = vpop.eup %918  ;;  %574 = vst.msk [vmem:[%s1081_s21 + $0x128] sm:$0xff] %vm536_vm0, %v506_v21  ;;  %v508_v49 = vadd.f32 0.5, %v442_v47  ;;  %v444_v31 = vmul.f32 0.5, %v917_v52  ;;  %930 = vtanh.f32 %v1245_v48  ;;  %v630_v44 = vadd.f32 %v617_v51, %v1160_v55 }
  0x4f   : > { %v921_v0 = vpop.eup %920  ;;  %575 = vst [vmem:[%s1081_s21 + $0x130] sm:$0xff] %v507_v57  ;;  %v509_v11 = vadd.f32 0.5, %v443_v42  ;;  %v445_v45 = vmul.f32 0.5, %v919_v34  ;;  %932 = vtanh.f32 %v1249_v7  ;;  %v660_v48 = vmul.f32 %v1103_v63, %v653_v38 }
  0x50   : > { %v923_v32 = vpop.eup %922  ;;  %576 = vst.msk [vmem:[%s1081_s21 + $0x138] sm:$0xff] %vm536_vm0, %v508_v49  ;;  %v510_v50 = vadd.f32 0.5, %v444_v31  ;;  %v446_v36 = vmul.f32 0.5, %v921_v0  ;;  %934 = vtanh.f32 %v1255_v9  ;;  %v661_v7 = vmul.f32 %v1115_v12, %v653_v38  ;;  %v620_v9 = vld.sshfl [vmem:[#allocation1 + $0x8] sm:$0xff pattern:$0x73625140] }
  0x51   : > { %v925_v43 = vpop.eup %924  ;;  %577 = vst [vmem:[%s1081_s21 + $0x140] sm:$0xff] %v509_v11  ;;  %v511_v54 = vadd.f32 0.5, %v445_v45  ;;  %v449_v33 = vmul.f32 0.5, %v923_v32  ;;  %936 = vtanh.f32 %v1260_v27  ;;  %v1387_v63 = vsel %vm664_vm3, %v1158_v53, %v660_v48 }
  0x52   : > { %v927_v55 = vpop.eup %926  ;;  %578 = vst.msk [vmem:[%s1081_s21 + $0x148] sm:$0xff] %vm536_vm0, %v510_v50  ;;  %v512_v58 = vadd.f32 0.5, %v446_v36  ;;  %v450_v18 = vmul.f32 0.5, %v925_v43  ;;  %938 = vtanh.f32 %v1266_v39  ;;  %v1392_v12 = vsel %vm664_vm3, %v630_v44, %v661_v7 }
  0x53   : > { %v929_v26 = vpop.eup %928  ;;  %579 = vst [vmem:[%s1081_s21 + $0x150] sm:$0x1f] %v511_v54  ;;  %v515_v1 = vadd.f32 0.5, %v449_v33  ;;  %v451_v27 = vmul.f32 0.5, %v927_v55  ;;  %940 = vtanh.f32 %v1271_v61  ;;  %v988_v35 = vmov 23.0  }
  0x54   : > { %v931_v59 = vpop.eup %930  ;;  %580 = vst.msk [vmem:[%s1081_s21 + $0x158] sm:$0x1f] %vm557_vm1, %v512_v58  ;;  %v516_v37 = vadd.f32 0.5, %v450_v18  ;;  %v452_v39 = vmul.f32 0.5, %v929_v26  ;;  %942 = vtanh.f32 %v1277_v8  ;;  %v636_v61 = vsel %vm633_vm2, 33.0, %v988_v35 }
  0x55   : > { %v933_v53 = vpop.eup %932  ;;  %583 = vst [vmem:[%s1081_s21 + $0x170] sm:$0xff] %v515_v1  ;;  %v517_v28 = vadd.f32 0.5, %v451_v27  ;;  %v453_v2 = vmul.f32 0.5, %v931_v59  ;;  %944 = vtanh.f32 %v1282_v15  ;;  %v654_v60 = vrot.slane %v636_v61, 6 }
  0x56   : > { %v935_v14 = vpop.eup %934  ;;  %584 = vst.msk [vmem:[%s1081_s21 + $0x178] sm:$0xff] %vm536_vm0, %v516_v37  ;;  %v518_v30 = vadd.f32 0.5, %v452_v39  ;;  %v454_v13 = vmul.f32 0.5, %v933_v53  ;;  %946 = vtanh.f32 %v1288_v10  ;;  %v632_v15 = vadd.f32 %v620_v9, %v1187_v23 }
  0x57   : > { %v937_v8 = vpop.eup %936  ;;  %585 = vst [vmem:[%s1081_s21 + $0x180] sm:$0xff] %v517_v28  ;;  %v519_v46 = vadd.f32 0.5, %v453_v2  ;;  %v455_v16 = vmul.f32 0.5, %v935_v14  ;;  %948 = vtanh.f32 %v1293_v17  ;;  %v662_v10 = vmul.f32 %v1135_v25, %v654_v60 }
  0x58   : > { %v939_v5 = vpop.eup %938  ;;  %586 = vst.msk [vmem:[%s1081_s21 + $0x188] sm:$0xff] %vm536_vm0, %v518_v30  ;;  %v520_v21 = vadd.f32 0.5, %v454_v13  ;;  %v456_v47 = vmul.f32 0.5, %v937_v8  ;;  %950 = vtanh.f32 %v1299_v22  ;;  %v663_v17 = vmul.f32 %v1149_v41, %v654_v60 }
  0x59   : > { %v941_v51 = vpop.eup %940  ;;  %587 = vst [vmem:[%s1081_s21 + $0x190] sm:$0xff] %v519_v46  ;;  %v521_v52 = vadd.f32 0.5, %v455_v16  ;;  %v457_v57 = vmul.f32 0.5, %v939_v5  ;;  %952 = vtanh.f32 %v1304_v4  ;;  %v669_v25 = vsel %vm664_vm3, %v1185_v20, %v662_v10 }
  0x5a   : > { %v943_v23 = vpop.eup %942  ;;  %588 = vst.msk [vmem:[%s1081_s21 + $0x198] sm:$0xff] %vm536_vm0, %v520_v21  ;;  %v522_v42 = vadd.f32 0.5, %v456_v47  ;;  %v458_v29 = vmul.f32 0.5, %v941_v51  ;;  %954 = vtanh.f32 %v1310_v56  ;;  %v670_v41 = vsel %vm664_vm3, %v632_v15, %v663_v17 }
  0x5b   : > { %v945_v22 = vpop.eup %944  ;;  %589 = vst [vmem:[%s1081_s21 + $0x1a0] sm:$0xff] %v521_v52  ;;  %v523_v62 = vadd.f32 0.5, %v457_v57  ;;  %v459_v34 = vmul.f32 0.5, %v943_v23  ;;  %956 = vtanh.f32 %v1314_v3 }
  0x5c   : > { %v947_v4 = vpop.eup %946  ;;  %590 = vst.msk [vmem:[%s1081_s21 + $0x1a8] sm:$0xff] %vm536_vm0, %v522_v42  ;;  %v524_v49 = vadd.f32 0.5, %v458_v29  ;;  %v460_v31 = vmul.f32 0.5, %v945_v22  ;;  %958 = vtanh.f32 %v1319_v6 }
  0x5d   : > { %v949_v56 = vpop.eup %948  ;;  %591 = vst [vmem:[%s1081_s21 + $0x1b0] sm:$0xff] %v523_v62  ;;  %v525_v20 = vadd.f32 0.5, %v459_v34  ;;  %v461_v38 = vmul.f32 0.5, %v947_v4  ;;  %960 = vtanh.f32 %v1358_v19 }
  0x5e   : > { %v951_v0 = vpop.eup %950  ;;  %592 = vst.msk [vmem:[%s1081_s21 + $0x1b8] sm:$0xff] %vm536_vm0, %v524_v49  ;;  %v526_v3 = vadd.f32 0.5, %v460_v31  ;;  %v462_v11 = vmul.f32 0.5, %v949_v56 }
  0x5f   : > { %v953_v45 = vpop.eup %952  ;;  %593 = vst [vmem:[%s1081_s21 + $0x1c0] sm:$0xff] %v525_v20  ;;  %v527_v44 = vadd.f32 0.5, %v461_v38  ;;  %v463_v32 = vmul.f32 0.5, %v951_v0 }
  0x60   : > { %v955_v50 = vpop.eup %954  ;;  %594 = vst.msk [vmem:[%s1081_s21 + $0x1c8] sm:$0xff] %vm536_vm0, %v526_v3  ;;  %v528_v6 = vadd.f32 0.5, %v462_v11  ;;  %v464_v36 = vmul.f32 0.5, %v953_v45 }
  0x61   : > { %v957_v48 = vpop.eup %956  ;;  %595 = vst [vmem:[%s1081_s21 + $0x1d0] sm:$0xff] %v527_v44  ;;  %v529_v19 = vadd.f32 0.5, %v463_v32  ;;  %v465_v43 = vmul.f32 0.5, %v955_v50 }
  0x62   : > { %v959_v54 = vpop.eup %958  ;;  %596 = vst.msk [vmem:[%s1081_s21 + $0x1d8] sm:$0xff] %vm536_vm0, %v528_v6  ;;  %v530_v33 = vadd.f32 0.5, %v464_v36  ;;  %v466_v7 = vmul.f32 0.5, %v957_v48 }
  0x63   : > { %v961_v55 = vpop.eup %960  ;;  %597 = vst [vmem:[%s1081_s21 + $0x1e0] sm:$0xff] %v529_v19  ;;  %v531_v58 = vadd.f32 0.5, %v465_v43  ;;  %v467_v18 = vmul.f32 0.5, %v959_v54 }
  0x64   : > { %598 = vst.msk [vmem:[%s1081_s21 + $0x1e8] sm:$0xff] %vm536_vm0, %v530_v33  ;;  %v532_v9 = vadd.f32 0.5, %v466_v7  ;;  %v468_v26 = vmul.f32 0.5, %v961_v55 }
  0x65   : > { %599 = vst [vmem:[%s1081_s21 + $0x1f0] sm:$0xff] %v531_v58  ;;  %v533_v1 = vadd.f32 0.5, %v467_v18 }
  0x66   : > { %600 = vst.msk [vmem:[%s1081_s21 + $0x1f8] sm:$0xff] %vm536_vm0, %v532_v9  ;;  %v534_v27 = vadd.f32 0.5, %v468_v26 }
  0x67   : > { %601 = vst [vmem:[%s1081_s21 + $0x200] sm:$0x1f] %v533_v1 }
  0x68   : > { %602 = vst.msk [vmem:[%s1081_s21 + $0x208] sm:$0x1f] %vm557_vm1, %v534_v27 }
  0x69   : > { %671 = vst [vmem:[%s1081_s21] sm:$0xf] %v1346_v40 }
  0x6a   : > { %673 = vst.msk [vmem:[%s1081_s21 + $0x8] sm:$0xf] %vm672_vm4, %v1364_v24 }
  0x6b   : > { %674 = vst [vmem:[%s1081_s21 + $0xb0] sm:$0xf] %v1387_v63 }
  0x6c   : > { %675 = vst.msk [vmem:[%s1081_s21 + $0xb8] sm:$0xf] %vm672_vm4, %v1392_v12 }
  0x6d   : > { %676 = vst [vmem:[%s1081_s21 + $0x160] sm:$0xf] %v669_v25 }
  0x6e   : > { %677 = vst.msk [vmem:[%s1081_s21 + $0x168] sm:$0xf] %vm672_vm4, %v670_v41 }
  0x6f PF: > { %s12_s11 = sadd.s32 1, %s984_s11   ;;  %s1465_s9 = smov %s980_s10 }
  0x70   : > { %p9_p5 = scmp.ge.s32.totalorder %s12_s11, 4   ;;  %s1466_s10 = smov %s1468_s12 }
  0x72   :  { %11 = sbr.rel (!%p9_p5) target bundleno = 2 (0x2), region = 62 }

</bundles_post_ra>
